<compile_context>
chip_gen: v7x
topology: tpu7x:2x2x1
jax: 0.10.0
libtpu: 0.0.40
codegen_flags: <defaults>
</compile_context>

<pallas_src>
import jax
import jax.numpy as jnp
from jax.experimental import pallas as pl
from jax.experimental.pallas import tpu as pltpu


_D = 7                          # hidden dim of the Affine tower
_TOKENS_PER_ROW = 128           # tokens per lane-dense row
_LANES = _D * _TOKENS_PER_ROW   # 896 = 7 * 128, a multiple of 128 lanes
_MAX_TILE_ROWS = 1024           # (1024, 896) f32 = 3.5 MiB per buffer


def _round_up(x, m):
    return ((x + m - 1) // m) * m


def _pick_tile_rows(R):
    """Block rows: big enough to amortize step overhead, >=2 steps for megacore."""
    if R <= 8:
        return R  # tiny input: one full-extent block (splitting only adds overhead)
    half = _round_up(pl.cdiv(R, 2), 8)     # guarantee >= 2 grid steps (v7x 2 TCs)
    return min(_MAX_TILE_ROWS, half)


def _build_shifted_params(A, b, lanes=_LANES):
    """Host precompute of the lane-dense shifted weights / bias pattern.

    W[idx, c] = A[(c%7)+d, c%7] for d = idx-6 when 0 <= (c%7)+d < 7, else 0.
    bias[0, c] = b[c % 7].
    The zero entries also cancel the roll wrap-around at the 896 boundary.
    """
    D = A.shape[0]
    n = jnp.arange(lanes) % D
    rows = []
    for d in range(-(D - 1), D):
        k = n + d
        valid = (k >= 0) & (k < D)
        kc = jnp.clip(k, 0, D - 1)
        rows.append(jnp.where(valid, A[kc, n], 0.0))
    W = jnp.stack(rows, axis=0).astype(jnp.float32)          # (2*D-1, lanes)
    bias = b[n].reshape(1, lanes).astype(jnp.float32)        # (1, lanes)
    return W, bias


def _affine_dense_kernel(z_ref, w_ref, b_ref, o_ref):
    """Lane-dense affine: o = bias + sum_d roll(z, -d) * W_d (all f32 compute)."""
    z = z_ref[...].astype(jnp.float32)                 # (tm, 896), fused cast-in
    # d = 0 term (no roll) + bias pattern.
    acc = z * w_ref[_D - 1:_D, :] + b_ref[...]
    for idx, d in enumerate(range(-(_D - 1), _D)):
        if d == 0:
            continue
        shifted = pltpu.roll(z, shift=(-d) % _LANES, axis=1)   # z[., c] -> z[., c+d]
        acc = acc + shifted * w_ref[idx:idx + 1, :]
    o_ref[...] = acc.astype(o_ref.dtype)               # fused cast-out


def _affine_dense(x_flat, W_shift, bias_lane):
    """x_flat: (M, 7) with M % 128 == 0.  Returns (M, 7) in x_flat.dtype."""
    M, D = x_flat.shape
    assert D == _D and M % _TOKENS_PER_ROW == 0
    out_dtype = x_flat.dtype
    R = M // _TOKENS_PER_ROW
    z = x_flat.reshape(R, _LANES)        # free view: row-major contiguous
    tm = _pick_tile_rows(R)
    grid = (pl.cdiv(R, tm),)

    isz = x_flat.dtype.itemsize
    cost = pl.CostEstimate(
        flops=2 * M * D * D,
        transcendentals=0,
        bytes_accessed=M * D * 2 * isz + (2 * D - 1) * _LANES * 4 + _LANES * 4,
    )

    y = pl.pallas_call(
        _affine_dense_kernel,
        out_shape=jax.ShapeDtypeStruct((R, _LANES), out_dtype),
        grid=grid,
        in_specs=[
            pl.BlockSpec((tm, _LANES), lambda i: (i, 0)),
            pl.BlockSpec((2 * _D - 1, _LANES), lambda i: (0, 0)),  # DMA'd once
            pl.BlockSpec((1, _LANES), lambda i: (0, 0)),           # DMA'd once
        ],
        out_specs=pl.BlockSpec((tm, _LANES), lambda i: (i, 0)),
        compiler_params=pltpu.CompilerParams(
            dimension_semantics=("parallel",),       # shards steps across TCs on v7x
            vmem_limit_bytes=32 * 1024 * 1024,       # 4 x 3.5 MiB buffers fit easily
        ),
        cost_estimate=cost,
    )(z, W_shift, bias_lane)
    return y.reshape(M, D)


@jax.jit
def affine_apply(x_flat, W_shift, bias_lane):
    """y = x_flat @ A + b via the lane-dense kernel; output in x_flat.dtype."""
    M, D = x_flat.shape
    rem = M % _TOKENS_PER_ROW
    if rem == 0:
        return _affine_dense(x_flat, W_shift, bias_lane)
    # TODO(synk): prefer making B*S a multiple of 128 upstream (or fusing this
    # tiny affine into neighbouring ops); padding here re-adds one HBM pass.
    pad = _TOKENS_PER_ROW - rem
    xp = jnp.pad(x_flat, ((0, pad), (0, 0)))
    return _affine_dense(xp, W_shift, bias_lane)[:M]


class SyntheticVisionTowerPallas:
    """JAX/Pallas equivalent of SyntheticVisionTower's forward pass."""

    def __init__(self, dim=7):
        assert dim == _D
        self.hidden_dim = dim
        # The PyTorch module registers zero buffers and loads a checkpoint;
        # here we initialize deterministically instead.
        key = jax.random.PRNGKey(42)
        ka, kb = jax.random.split(key)
        self.A = jax.random.normal(ka, (dim, dim), dtype=jnp.float32) * 0.1
        self.b = jax.random.normal(kb, (dim,), dtype=jnp.float32) * 0.1
        # Host-precomputed lane-dense shifted weights / bias pattern.
        self.W_shift, self.bias_lane = _build_shifted_params(self.A, self.b)

    @property
    def dtype(self):
        return self.A.dtype

    @property
    def hidden_size(self):
        return self.hidden_dim

    @property
    def num_patches(self):
        return 6

    def forward_inner(self, x):
        # x: (B, S, D); cast-to-f32 and cast-back-to-input-dtype fused in-kernel.
        B, S, D = x.shape
        y_flat = affine_apply(x.reshape(B * S, D), self.W_shift, self.bias_lane)
        return y_flat.reshape(B, S, D)

    def forward(self, images):
        if isinstance(images, list):
            # Mirrors the PyTorch code: processes the first image (unsqueezed
            # to batch 1) and returns inside the loop.
            image_features = []
            for image in images:
                feat = self.forward_inner(image[None, ...])
                image_features.append(feat.astype(image.dtype))
                return image_features
            return image_features
        # Output dtype already equals images.dtype (cast fused in-kernel).
        return self.forward_inner(images)


if __name__ == "__main__":
    tower = SyntheticVisionTowerPallas(dim=7)
    D = tower.hidden_size
    key = jax.random.PRNGKey(0)
    k1, k2, k3 = jax.random.split(key, 3)

    def ref_fn(x):
        y = jnp.dot(x.astype(jnp.float32).reshape(-1, D), tower.A,
                    precision=jax.lax.Precision.HIGHEST) + tower.b
        return y.reshape(x.shape).astype(x.dtype)

    # (1) Lane-dense path, single full-extent block (B*S = 128 tokens), f32.
    x1 = jax.random.normal(k1, (2, 64, D), dtype=jnp.float32)
    o1 = jax.block_until_ready(tower.forward(x1))
    assert o1.shape == x1.shape and o1.dtype == x1.dtype
    assert jnp.allclose(o1, ref_fn(x1), atol=1e-5, rtol=1e-5), "mismatch (f32, dense)"

    # (2) Lane-dense path, multi-step grid (R=24 -> 2 parallel steps), bf16 io.
    x2 = jax.random.normal(k2, (3, 1024, D), dtype=jnp.bfloat16)
    o2 = jax.block_until_ready(tower.forward(x2))
    assert o2.dtype == jnp.bfloat16
    assert jnp.allclose(o2.astype(jnp.float32), ref_fn(x2).astype(jnp.float32),
                        atol=5e-2, rtol=5e-2), "mismatch (bf16, dense)"

    # (3) Token count not a multiple of 128 -> padded fallback path, f32.
    x3 = jax.random.normal(k3, (2, 50, D), dtype=jnp.float32)
    o3 = jax.block_until_ready(tower.forward(x3))
    assert jnp.allclose(o3, ref_fn(x3), atol=1e-5, rtol=1e-5), "mismatch (f32, padded)"

    # (4) List input path (mirrors the PyTorch early-return behaviour).
    feats = tower.forward([x1[0], x1[1]])
    jax.block_until_ready(feats)
    assert len(feats) == 1 and feats[0].shape == (1, 64, D)

    print("KERNEL_OK")
</pallas_src>

<mosaic_0001>
module attributes {stable_mosaic.version = 11 : i64} {
  func.func @_affine_dense_kernel(%arg0: i32, %arg1: memref<1x896xf32, #tpu.memory_space<vmem>>, %arg2: memref<13x896xf32, #tpu.memory_space<vmem>>, %arg3: memref<1x896xf32, #tpu.memory_space<vmem>>, %arg4: memref<1x896xf32, #tpu.memory_space<vmem>>) attributes {dimension_semantics = [#tpu.dimension_semantics<parallel>], iteration_bounds = array<i64: 1>, scalar_prefetch = 0 : i64, scratch_operands = 0 : i64, tpu.core_type = #tpu.core_type<tc>, window_params = [{transform_indices = @transform_0, window_bounds = array<i64: 1, 896>}, {pipeline_mode = #tpu.pipeline_mode<synchronous>, transform_indices = @transform_1, window_bounds = array<i64: 13, 896>}, {pipeline_mode = #tpu.pipeline_mode<synchronous>, transform_indices = @transform_2, window_bounds = array<i64: 1, 896>}, {transform_indices = @transform_3, window_bounds = array<i64: 1, 896>}]} {
    %c0 = arith.constant 0 : index
    %c0_0 = arith.constant 0 : index
    %0 = vector.load %arg1[%c0, %c0_0] : memref<1x896xf32, #tpu.memory_space<vmem>>, vector<1x896xf32>
    %c6 = arith.constant 6 : index
    %c0_1 = arith.constant 0 : index
    %1 = vector.load %arg2[%c6, %c0_1] : memref<13x896xf32, #tpu.memory_space<vmem>>, vector<1x896xf32>
    %2 = arith.mulf %0, %1 : vector<1x896xf32>
    %c0_2 = arith.constant 0 : index
    %c0_3 = arith.constant 0 : index
    %3 = vector.load %arg3[%c0_2, %c0_3] : memref<1x896xf32, #tpu.memory_space<vmem>>, vector<1x896xf32>
    %4 = arith.addf %2, %3 : vector<1x896xf32>
    %c6_i32 = arith.constant 6 : i32
    %5 = tpu.dynamic_rotate %0 by %c6_i32 dim 1 : vector<1x896xf32>, i32 -> vector<1x896xf32>
    %c0_4 = arith.constant 0 : index
    %c0_5 = arith.constant 0 : index
    %6 = vector.load %arg2[%c0_4, %c0_5] : memref<13x896xf32, #tpu.memory_space<vmem>>, vector<1x896xf32>
    %7 = arith.mulf %5, %6 : vector<1x896xf32>
    %8 = arith.addf %4, %7 : vector<1x896xf32>
    %c5_i32 = arith.constant 5 : i32
    %9 = tpu.dynamic_rotate %0 by %c5_i32 dim 1 : vector<1x896xf32>, i32 -> vector<1x896xf32>
    %c1 = arith.constant 1 : index
    %c0_6 = arith.constant 0 : index
    %10 = vector.load %arg2[%c1, %c0_6] : memref<13x896xf32, #tpu.memory_space<vmem>>, vector<1x896xf32>
    %11 = arith.mulf %9, %10 : vector<1x896xf32>
    %12 = arith.addf %8, %11 : vector<1x896xf32>
    %c4_i32 = arith.constant 4 : i32
    %13 = tpu.dynamic_rotate %0 by %c4_i32 dim 1 : vector<1x896xf32>, i32 -> vector<1x896xf32>
    %c2 = arith.constant 2 : index
    %c0_7 = arith.constant 0 : index
    %14 = vector.load %arg2[%c2, %c0_7] : memref<13x896xf32, #tpu.memory_space<vmem>>, vector<1x896xf32>
    %15 = arith.mulf %13, %14 : vector<1x896xf32>
    %16 = arith.addf %12, %15 : vector<1x896xf32>
    %c3_i32 = arith.constant 3 : i32
    %17 = tpu.dynamic_rotate %0 by %c3_i32 dim 1 : vector<1x896xf32>, i32 -> vector<1x896xf32>
    %c3 = arith.constant 3 : index
    %c0_8 = arith.constant 0 : index
    %18 = vector.load %arg2[%c3, %c0_8] : memref<13x896xf32, #tpu.memory_space<vmem>>, vector<1x896xf32>
    %19 = arith.mulf %17, %18 : vector<1x896xf32>
    %20 = arith.addf %16, %19 : vector<1x896xf32>
    %c2_i32 = arith.constant 2 : i32
    %21 = tpu.dynamic_rotate %0 by %c2_i32 dim 1 : vector<1x896xf32>, i32 -> vector<1x896xf32>
    %c4 = arith.constant 4 : index
    %c0_9 = arith.constant 0 : index
    %22 = vector.load %arg2[%c4, %c0_9] : memref<13x896xf32, #tpu.memory_space<vmem>>, vector<1x896xf32>
    %23 = arith.mulf %21, %22 : vector<1x896xf32>
    %24 = arith.addf %20, %23 : vector<1x896xf32>
    %c1_i32 = arith.constant 1 : i32
    %25 = tpu.dynamic_rotate %0 by %c1_i32 dim 1 : vector<1x896xf32>, i32 -> vector<1x896xf32>
    %c5 = arith.constant 5 : index
    %c0_10 = arith.constant 0 : index
    %26 = vector.load %arg2[%c5, %c0_10] : memref<13x896xf32, #tpu.memory_space<vmem>>, vector<1x896xf32>
    %27 = arith.mulf %25, %26 : vector<1x896xf32>
    %28 = arith.addf %24, %27 : vector<1x896xf32>
    %c895_i32 = arith.constant 895 : i32
    %29 = tpu.dynamic_rotate %0 by %c895_i32 dim 1 : vector<1x896xf32>, i32 -> vector<1x896xf32>
    %c7 = arith.constant 7 : index
    %c0_11 = arith.constant 0 : index
    %30 = vector.load %arg2[%c7, %c0_11] : memref<13x896xf32, #tpu.memory_space<vmem>>, vector<1x896xf32>
    %31 = arith.mulf %29, %30 : vector<1x896xf32>
    %32 = arith.addf %28, %31 : vector<1x896xf32>
    %c894_i32 = arith.constant 894 : i32
    %33 = tpu.dynamic_rotate %0 by %c894_i32 dim 1 : vector<1x896xf32>, i32 -> vector<1x896xf32>
    %c8 = arith.constant 8 : index
    %c0_12 = arith.constant 0 : index
    %34 = vector.load %arg2[%c8, %c0_12] : memref<13x896xf32, #tpu.memory_space<vmem>>, vector<1x896xf32>
    %35 = arith.mulf %33, %34 : vector<1x896xf32>
    %36 = arith.addf %32, %35 : vector<1x896xf32>
    %c893_i32 = arith.constant 893 : i32
    %37 = tpu.dynamic_rotate %0 by %c893_i32 dim 1 : vector<1x896xf32>, i32 -> vector<1x896xf32>
    %c9 = arith.constant 9 : index
    %c0_13 = arith.constant 0 : index
    %38 = vector.load %arg2[%c9, %c0_13] : memref<13x896xf32, #tpu.memory_space<vmem>>, vector<1x896xf32>
    %39 = arith.mulf %37, %38 : vector<1x896xf32>
    %40 = arith.addf %36, %39 : vector<1x896xf32>
    %c892_i32 = arith.constant 892 : i32
    %41 = tpu.dynamic_rotate %0 by %c892_i32 dim 1 : vector<1x896xf32>, i32 -> vector<1x896xf32>
    %c10 = arith.constant 10 : index
    %c0_14 = arith.constant 0 : index
    %42 = vector.load %arg2[%c10, %c0_14] : memref<13x896xf32, #tpu.memory_space<vmem>>, vector<1x896xf32>
    %43 = arith.mulf %41, %42 : vector<1x896xf32>
    %44 = arith.addf %40, %43 : vector<1x896xf32>
    %c891_i32 = arith.constant 891 : i32
    %45 = tpu.dynamic_rotate %0 by %c891_i32 dim 1 : vector<1x896xf32>, i32 -> vector<1x896xf32>
    %c11 = arith.constant 11 : index
    %c0_15 = arith.constant 0 : index
    %46 = vector.load %arg2[%c11, %c0_15] : memref<13x896xf32, #tpu.memory_space<vmem>>, vector<1x896xf32>
    %47 = arith.mulf %45, %46 : vector<1x896xf32>
    %48 = arith.addf %44, %47 : vector<1x896xf32>
    %c890_i32 = arith.constant 890 : i32
    %49 = tpu.dynamic_rotate %0 by %c890_i32 dim 1 : vector<1x896xf32>, i32 -> vector<1x896xf32>
    %c12 = arith.constant 12 : index
    %c0_16 = arith.constant 0 : index
    %50 = vector.load %arg2[%c12, %c0_16] : memref<13x896xf32, #tpu.memory_space<vmem>>, vector<1x896xf32>
    %51 = arith.mulf %49, %50 : vector<1x896xf32>
    %52 = arith.addf %48, %51 : vector<1x896xf32>
    %c0_17 = arith.constant 0 : index
    %c0_18 = arith.constant 0 : index
    %53 = vector.load %arg4[%c0_17, %c0_18] : memref<1x896xf32, #tpu.memory_space<vmem>>, vector<1x896xf32>
    tpu.vector_store %arg4[%c0_17, %c0_18], %52 {strides = array<i32>} : memref<1x896xf32, #tpu.memory_space<vmem>>, vector<1x896xf32>,
    return
  }
  func.func @transform_0(%arg0: i32) -> (i32, i32) {
    %c0_i32 = arith.constant 0 : i32
    %c0_i32_0 = arith.constant 0 : i32
    return %arg0, %c0_i32 : i32, i32
  }
  func.func @transform_1(%arg0: i32) -> (i32, i32) {
    %c0_i32 = arith.constant 0 : i32
    %c0_i32_0 = arith.constant 0 : i32
    %c0_i32_1 = arith.constant 0 : i32
    return %c0_i32, %c0_i32_0 : i32, i32
  }
  func.func @transform_2(%arg0: i32) -> (i32, i32) {
    %c0_i32 = arith.constant 0 : i32
    %c0_i32_0 = arith.constant 0 : i32
    %c0_i32_1 = arith.constant 0 : i32
    return %c0_i32, %c0_i32_0 : i32, i32
  }
  func.func @transform_3(%arg0: i32) -> (i32, i32) {
    %c0_i32 = arith.constant 0 : i32
    %c0_i32_0 = arith.constant 0 : i32
    return %arg0, %c0_i32 : i32, i32
  }
}

</mosaic_0001>

<bundles_post_ra>
// kernel: affine_apply.1
= control target key start
LH: loop header
LB: loop body
LE: loop exit
PB: predicated region body
PF: predicated region fallthrough
CT: control target
= control target key end

     0   :  { %v23_v0 = vlaneseq  ;;  %s1618_s14 = smov 5   ;;  %s1619_s15 = smov 4   ;;  %v1625_v19 = vmov 1966171168   ;;  %s2256_s0 = inlined_call_operand.vmem [shape: f32[1,896], index: 0, kind: input, shape index: {}]   ;;  %s2257_s1 = inlined_call_operand.vmem [shape: f32[13,896], index: 1, kind: input, shape index: {}]   ;;  %s2258_s2 = inlined_call_operand.vmem [shape: f32[1,896], index: 2, kind: input, shape index: {}]   ;;  %s2259_s3 = inlined_call_operand.vmem [shape: f32[1,896], index: 3, kind: output, shape index: {}]  }
   0x1   :  { %v1656_v2 = vld [vmem:[%s2256_s0] sm:$0xff]  ;;  %s1617_s0 = smov 6   ;;  %s1620_s16 = smov 3   ;;  %v139_v20 = vunpack.c.l.s4 %v1625_v19 }
   0x2   :  { %v1651_v1 = vshrl.u32 %v23_v0, 7  ;;  %s1621_s17 = smov 2   ;;  %s1622_s18 = smov 1   ;;  %v82_v17 = vld [vmem:[%s2257_s1] ss:$8 sm:$0xf] }
   0x3   :  { %s1623_s19 = smov 127   ;;  %s1624_s20 = smov 126   ;;  %v83_v18 = vld [vmem:[%s2257_s1] ss:$8 sm:$0xf0]  ;;  %v1774_v21 = vand.u32 127, %v23_v0  ;;  %v140_v23 = vunpack.c.0.s8 %v139_v20 }
   0x4   :  { %v1659_v3 = vsub.s32 2, %v1651_v1  ;;  %v1662_v4 = vsub.s32 0, %v1651_v1  ;;  %v1665_v5 = vsub.s32 3, %v1651_v1  ;;  %v1668_v6 = vsub.s32 1, %v1651_v1  ;;  %s1626_s25 = smov 125   ;;  %s1627_s30 = smov 124  }
   0x5   :  { %v1689_v11 = vsub.s32 5, %v1651_v1  ;;  %v1692_v12 = vsub.s32 4, %v1651_v1  ;;  %v1705_v15 = vsub.s32 6, %v1651_v1  ;;  %v84_v22 = vor.u32 %v83_v18, %v82_v17  ;;  %v1580_v44 = vld [vmem:[%s2257_s1 + $0x6] ss:$8 sm:$0xf] }
   0x6   :  { %v1672_v7 = vrot.slane %v1656_v2, %v1659_v3  ;;  %v1676_v8 = vrot.slane %v1656_v2, %v1662_v4  ;;  %v1682_v9 = vrot.slane %v1656_v2, %v1665_v5  ;;  %v1686_v10 = vrot.slane %v1656_v2, %v1668_v6  ;;  %v1581_v45 = vld [vmem:[%s2257_s1 + $0x6] ss:$8 sm:$0xf0]  ;;  %v1582_v51 = vld [vmem:[%s2257_s1 + $0x1] ss:$8 sm:$0xf] }
   0x7   :  { %v1698_v13 = vrot.slane %v1656_v2, %v1689_v11  ;;  %v1702_v14 = vrot.slane %v1656_v2, %v1692_v12  ;;  %v1711_v16 = vrot.slane %v1656_v2, %v1705_v15  ;;  %vm74_vm0 = vcmp.lt.s32.totalorder %v1774_v21, 6  ;;  %v1583_v52 = vld [vmem:[%s2257_s1 + $0x1] ss:$8 sm:$0xf0]  ;;  %s1628_s13 = smov 123  }
   0x8   :  { %62 = vrot.lane.b32.xlu1 %v1672_v7, %s1617_s0  ;;  %58 = vrot.lane.b32.xlu0 %v1676_v8, %s1617_s0  ;;  %v101_v26 = vrot.slane %v84_v22, %v1665_v5  ;;  %v97_v27 = vrot.slane %v84_v22, %v1659_v3  ;;  %v1784_v28 = vsub.s32 %v140_v23, %v1651_v1  ;;  %vm199_vm1 = vcmp.lt.s32.totalorder %v1774_v21, 5 }
   0x9   :  { %v105_v34 = vrot.slane %v84_v22, %v1692_v12  ;;  %v109_v37 = vrot.slane %v84_v22, %v1689_v11  ;;  %v93_v38 = vrot.slane %v84_v22, %v1668_v6  ;;  %v89_v46 = vrot.slane %v84_v22, %v1662_v4 }
   0xa   :  { %v113_v47 = vrot.slane %v84_v22, %v1705_v15  ;;  %v18_v55 = vor.u32 %v1581_v45, %v1580_v44  ;;  %v210_v60 = vor.u32 %v1583_v52, %v1582_v51  ;;  %v20_v22 = vld [vmem:[%s2258_s2] sm:$0xff]  ;;  %vm325_vm2 = vcmp.lt.s32.totalorder %v1774_v21, 4 }
   0xb   :  { %vm451_vm3 = vcmp.lt.s32.totalorder %v1774_v21, 3  ;;  %vm577_vm4 = vcmp.lt.s32.totalorder %v1774_v21, 2  ;;  %vm703_vm5 = vcmp.lt.s32.totalorder %v1774_v21, 1  ;;  %vm829_vm6 = vcmp.lt.s32.totalorder %v1774_v21, 127 }
   0xc   :  { %64 = vrot.lane.b32.xlu1 %v1682_v9, %s1617_s0  ;;  %60 = vrot.lane.b32.xlu0 %v1686_v10, %s1617_s0  ;;  %v19_v1 = vmul.f32 %v18_v55, %v1656_v2  ;;  %v223_v2 = vrot.slane %v210_v60, %v1659_v3  ;;  %v1585_v55 = vld [vmem:[%s2257_s1 + $0x2] ss:$8 sm:$0xf0]  ;;  %vm955_vm7 = vcmp.lt.s32.totalorder %v1774_v21, 126  ;;  %vm1081_vm8 = vcmp.lt.s32.totalorder %v1774_v21, 125 }
   0xd   :  { %vm1207_vm9 = vcmp.lt.s32.totalorder %v1774_v21, 124  ;;  %vm1333_vm10 = vcmp.lt.s32.totalorder %v1774_v21, 123  ;;  %vm1459_vm11 = vcmp.lt.s32.totalorder %v1774_v21, 122  ;;  %vm1573_vm12 = vcmp.lt.s32.totalorder %v23_v0, 896 }
  0x10   :  { %68 = vrot.lane.b32.xlu1 %v1698_v13, %s1617_s0  ;;  %66 = vrot.lane.b32.xlu0 %v1702_v14, %s1617_s0 }
  0x14   :  { %185 = vrot.lane.b32.xlu1 %v1676_v8, %s1618_s14  ;;  %70 = vrot.lane.b32.xlu0 %v1711_v16, %s1617_s0  ;;  %s1629_s0 = smov 122  }
  0x18   :  { %189 = vrot.lane.b32.xlu1 %v1672_v7, %s1618_s14  ;;  %187 = vrot.lane.b32.xlu0 %v1686_v10, %s1618_s14 }
  0x1c   :  { %193 = vrot.lane.b32.xlu1 %v1702_v14, %s1618_s14  ;;  %191 = vrot.lane.b32.xlu0 %v1682_v9, %s1618_s14 }
  0x20   :  { %197 = vrot.lane.b32.xlu1 %v1711_v16, %s1618_s14  ;;  %195 = vrot.lane.b32.xlu0 %v1698_v13, %s1618_s14 }
  0x24   :  { %313 = vrot.lane.b32.xlu1 %v1686_v10, %s1619_s15  ;;  %311 = vrot.lane.b32.xlu0 %v1676_v8, %s1619_s15 }
  0x28   :  { %317 = vrot.lane.b32.xlu1 %v1682_v9, %s1619_s15  ;;  %315 = vrot.lane.b32.xlu0 %v1672_v7, %s1619_s15 }
  0x2c   :  { %321 = vrot.lane.b32.xlu1 %v1698_v13, %s1619_s15  ;;  %319 = vrot.lane.b32.xlu0 %v1702_v14, %s1619_s15 }
  0x30   :  { %437 = vrot.lane.b32.xlu1 %v1676_v8, %s1620_s16  ;;  %323 = vrot.lane.b32.xlu0 %v1711_v16, %s1619_s15 }
  0x34   :  { %441 = vrot.lane.b32.xlu1 %v1672_v7, %s1620_s16  ;;  %439 = vrot.lane.b32.xlu0 %v1686_v10, %s1620_s16 }
  0x38   :  { %445 = vrot.lane.b32.xlu1 %v1702_v14, %s1620_s16  ;;  %443 = vrot.lane.b32.xlu0 %v1682_v9, %s1620_s16 }
  0x3c   :  { %449 = vrot.lane.b32.xlu1 %v1711_v16, %s1620_s16  ;;  %447 = vrot.lane.b32.xlu0 %v1698_v13, %s1620_s16 }
  0x40   :  { %565 = vrot.lane.b32.xlu1 %v1686_v10, %s1621_s17  ;;  %563 = vrot.lane.b32.xlu0 %v1676_v8, %s1621_s17 }
  0x44   :  { %569 = vrot.lane.b32.xlu1 %v1682_v9, %s1621_s17  ;;  %567 = vrot.lane.b32.xlu0 %v1672_v7, %s1621_s17 }
  0x48   :  { %573 = vrot.lane.b32.xlu1 %v1698_v13, %s1621_s17  ;;  %571 = vrot.lane.b32.xlu0 %v1702_v14, %s1621_s17 }
  0x4c   :  { %689 = vrot.lane.b32.xlu1 %v1676_v8, %s1622_s18  ;;  %575 = vrot.lane.b32.xlu0 %v1711_v16, %s1621_s17 }
  0x50   :  { %693 = vrot.lane.b32.xlu1 %v1672_v7, %s1622_s18  ;;  %691 = vrot.lane.b32.xlu0 %v1686_v10, %s1622_s18 }
  0x54   :  { %697 = vrot.lane.b32.xlu1 %v1702_v14, %s1622_s18  ;;  %695 = vrot.lane.b32.xlu0 %v1682_v9, %s1622_s18 }
  0x58   :  { %701 = vrot.lane.b32.xlu1 %v1711_v16, %s1622_s18  ;;  %699 = vrot.lane.b32.xlu0 %v1698_v13, %s1622_s18 }
  0x5c   :  { %817 = vrot.lane.b32.xlu1 %v1686_v10, %s1623_s19  ;;  %815 = vrot.lane.b32.xlu0 %v1676_v8, %s1623_s19 }
  0x60   :  { %821 = vrot.lane.b32.xlu1 %v1682_v9, %s1623_s19  ;;  %819 = vrot.lane.b32.xlu0 %v1672_v7, %s1623_s19 }
  0x64   :  { %825 = vrot.lane.b32.xlu1 %v1698_v13, %s1623_s19  ;;  %823 = vrot.lane.b32.xlu0 %v1702_v14, %s1623_s19 }
  0x68   :  { %941 = vrot.lane.b32.xlu1 %v1676_v8, %s1624_s20  ;;  %827 = vrot.lane.b32.xlu0 %v1711_v16, %s1623_s19 }
  0x6c   :  { %945 = vrot.lane.b32.xlu1 %v1672_v7, %s1624_s20  ;;  %943 = vrot.lane.b32.xlu0 %v1686_v10, %s1624_s20 }
  0x70   :  { %949 = vrot.lane.b32.xlu1 %v1702_v14, %s1624_s20  ;;  %947 = vrot.lane.b32.xlu0 %v1682_v9, %s1624_s20 }
  0x74   :  { %953 = vrot.lane.b32.xlu1 %v1711_v16, %s1624_s20  ;;  %951 = vrot.lane.b32.xlu0 %v1698_v13, %s1624_s20 }
  0x78   :  { %1069 = vrot.lane.b32.xlu1 %v1686_v10, %s1626_s25  ;;  %1067 = vrot.lane.b32.xlu0 %v1676_v8, %s1626_s25 }
  0x7a   :  { %v63_v24 = vpop.permute.xlu1 %62  ;;  %v59_v25 = vpop.permute.xlu0 %58 }
  0x7c   :  { %1073 = vrot.lane.b32.xlu1 %v1682_v9, %s1626_s25  ;;  %1071 = vrot.lane.b32.xlu0 %v1672_v7, %s1626_s25 }
  0x7e   :  { %v65_v29 = vpop.permute.xlu1 %64  ;;  %v61_v30 = vpop.permute.xlu0 %60 }
  0x7f   :  { %v78_v31 = vsel %vm74_vm0, %v63_v24, %v65_v29  ;;  %v79_v32 = vsel %vm74_vm0, %v61_v30, %v63_v24  ;;  %v80_v33 = vsel %vm74_vm0, %v59_v25, %v61_v30 }
  0x80   :  { %v124_v35 = vmul.f32 %v101_v26, %v78_v31  ;;  %v123_v36 = vmul.f32 %v97_v27, %v79_v32  ;;  %1077 = vrot.lane.b32.xlu1 %v1698_v13, %s1626_s25  ;;  %1075 = vrot.lane.b32.xlu0 %v1702_v14, %s1626_s25  ;;  %v122_v57 = vmul.f32 %v93_v38, %v80_v33 }
  0x81   :  { %v227_v27 = vrot.slane %v210_v60, %v1665_v5  ;;  %v219_v32 = vrot.slane %v210_v60, %v1668_v6  ;;  %v215_v38 = vrot.slane %v210_v60, %v1662_v4 }
  0x82   :  { %v136_v39 = vcombine.low %v123_v36, %v124_v35  ;;  %v69_v40 = vpop.permute.xlu1 %68  ;;  %v67_v41 = vpop.permute.xlu0 %66  ;;  %v231_v35 = vrot.slane %v210_v60, %v1692_v12 }
  0x83   :  { %v76_v42 = vsel %vm74_vm0, %v67_v41, %v69_v40  ;;  %v77_v43 = vsel %vm74_vm0, %v65_v29, %v67_v41  ;;  %v21_v29 = vadd.f32 %v20_v22, %v19_v1 }
  0x84   :  { %v151_v48 = vrot.slane %v136_v39, %v1784_v28  ;;  %v125_v49 = vmul.f32 %v105_v34, %v77_v43  ;;  %v126_v50 = vmul.f32 %v109_v37, %v76_v42  ;;  %1193 = vrot.lane.b32.xlu1 %v1676_v8, %s1627_s30  ;;  %1079 = vrot.lane.b32.xlu0 %v1711_v16, %s1626_s25 }
  0x85   :  { %v235_v42 = vrot.slane %v210_v60, %v1689_v11  ;;  %v239_v43 = vrot.slane %v210_v60, %v1705_v15 }
  0x86   :  { %v137_v53 = vcombine.low %v125_v49, %v126_v50  ;;  %v186_v54 = vpop.permute.xlu1 %185  ;;  %v71_v56 = vpop.permute.xlu0 %70 }
  0x87   :  { %v75_v58 = vsel %vm74_vm0, %v69_v40, %v71_v56  ;;  %v81_v59 = vsel %vm74_vm0, %v71_v56, %v59_v25 }
  0x88   :  { %v158_v61 = vrot.slane %v137_v53, %v1784_v28  ;;  %v121_v62 = vmul.f32 %v89_v46, %v81_v59  ;;  %v127_v63 = vmul.f32 %v113_v47, %v75_v58  ;;  %1197 = vrot.lane.b32.xlu1 %v1672_v7, %s1627_s30  ;;  %1195 = vrot.lane.b32.xlu0 %v1686_v10, %s1627_s30  ;;  %v1584_v53 = vld [vmem:[%s2257_s1 + $0x2] ss:$8 sm:$0xf] }
  0x8a   :  { %v135_v17 = vcombine.low %v121_v62, %v122_v57  ;;  %v165_v18 = vrot.slane %v127_v63, %v1784_v28  ;;  %v190_v19 = vpop.permute.xlu1 %189  ;;  %v188_v20 = vpop.permute.xlu0 %187  ;;  %v336_v63 = vor.u32 %v1585_v55, %v1584_v53 }
  0x8b   :  { %v204_v23 = vsel %vm199_vm1, %v188_v20, %v190_v19  ;;  %v205_v24 = vsel %vm199_vm1, %v186_v54, %v188_v20 }
  0x8c   :  { %v144_v25 = vrot.slane %v135_v17, %v1784_v28  ;;  %v167_v26 = vcombine.low %v158_v61, %v165_v18  ;;  %1201 = vrot.lane.b32.xlu1 %v1702_v14, %s1627_s30  ;;  %1199 = vrot.lane.b32.xlu0 %v1682_v9, %s1627_s30  ;;  %v249_v40 = vmul.f32 %v223_v2, %v204_v23 }
  0x8d   :  { %v248_v45 = vmul.f32 %v219_v32, %v205_v24  ;;  %v349_v22 = vrot.slane %v336_v63, %v1659_v3  ;;  %v353_v23 = vrot.slane %v336_v63, %v1665_v5 }
  0x8e   :  { %v166_v30 = vcombine.low %v144_v25, %v151_v48  ;;  %v181_v31 = vrot.slane %v167_v26, %v1784_v28  ;;  %v194_v33 = vpop.permute.xlu1 %193  ;;  %v192_v34 = vpop.permute.xlu0 %191 }
  0x8f   :  { %v202_v36 = vsel %vm199_vm1, %v192_v34, %v194_v33  ;;  %v203_v37 = vsel %vm199_vm1, %v190_v19, %v192_v34 }
  0x90   :  { %v174_v39 = vrot.slane %v166_v30, %v1784_v28  ;;  %v250_v41 = vmul.f32 %v227_v27, %v203_v37  ;;  %1205 = vrot.lane.b32.xlu1 %v1711_v16, %s1627_s30  ;;  %1203 = vrot.lane.b32.xlu0 %v1698_v13, %s1627_s30  ;;  %v251_v49 = vmul.f32 %v231_v35, %v202_v36 }
  0x91   :  { %v357_v30 = vrot.slane %v336_v63, %v1692_v12  ;;  %v345_v37 = vrot.slane %v336_v63, %v1668_v6 }
  0x92   :  { %v182_v44 = vcombine.low %v174_v39, %v181_v31  ;;  %v262_v46 = vcombine.low %v249_v40, %v250_v41  ;;  %v198_v47 = vpop.permute.xlu1 %197  ;;  %v196_v48 = vpop.permute.xlu0 %195  ;;  %v361_v31 = vrot.slane %v336_v63, %v1689_v11 }
  0x93   :  { %v206_v50 = vsel %vm199_vm1, %v198_v47, %v186_v54  ;;  %v200_v51 = vsel %vm199_vm1, %v196_v48, %v198_v47  ;;  %v201_v52 = vsel %vm199_vm1, %v194_v33, %v196_v48 }
  0x94   :  { %v184_v56 = vadd.f32 %v182_v44, %v21_v29  ;;  %v277_v57 = vrot.slane %v262_v46, %v1784_v28  ;;  %v247_v58 = vmul.f32 %v215_v38, %v206_v50  ;;  %v252_v59 = vmul.f32 %v235_v42, %v201_v52  ;;  %1321 = vrot.lane.b32.xlu1 %v1686_v10, %s1628_s13  ;;  %v1587_v50 = vld [vmem:[%s2257_s1 + $0x3] ss:$8 sm:$0xf0] }
  0x95   :  { %v253_v54 = vmul.f32 %v239_v43, %v200_v51  ;;  %1319 = vrot.lane.b32.xlu0 %v1676_v8, %s1628_s13  ;;  %v341_v43 = vrot.slane %v336_v63, %v1662_v4  ;;  %v365_v44 = vrot.slane %v336_v63, %v1705_v15 }
  0x96   :  { %v261_v60 = vcombine.low %v247_v58, %v248_v45  ;;  %v263_v61 = vcombine.low %v251_v49, %v252_v59  ;;  %v314_v62 = vpop.permute.xlu1 %313  ;;  %v312_v1 = vpop.permute.xlu0 %311  ;;  %v1586_v49 = vld [vmem:[%s2257_s1 + $0x3] ss:$8 sm:$0xf] }
  0x97   :  { %v291_v17 = vrot.slane %v253_v54, %v1784_v28  ;;  %v331_v18 = vsel %vm325_vm2, %v312_v1, %v314_v62 }
  0x98   :  { %v270_v19 = vrot.slane %v261_v60, %v1784_v28  ;;  %v284_v20 = vrot.slane %v263_v61, %v1784_v28  ;;  %1325 = vrot.lane.b32.xlu1 %v1682_v9, %s1628_s13 }
  0x99   :  { %1323 = vrot.lane.b32.xlu0 %v1672_v7, %s1628_s13 }
  0x9a   :  { %v292_v24 = vcombine.low %v270_v19, %v277_v57  ;;  %v293_v25 = vcombine.low %v284_v20, %v291_v17  ;;  %v318_v26 = vpop.permute.xlu1 %317  ;;  %v316_v2 = vpop.permute.xlu0 %315  ;;  %v374_v57 = vmul.f32 %v345_v37, %v331_v18 }
  0x9b   :  { %v329_v27 = vsel %vm325_vm2, %v316_v2, %v318_v26  ;;  %v330_v29 = vsel %vm325_vm2, %v314_v62, %v316_v2 }
  0x9c   :  { %v300_v32 = vrot.slane %v292_v24, %v1784_v28  ;;  %v307_v33 = vrot.slane %v293_v25, %v1784_v28  ;;  %v375_v34 = vmul.f32 %v349_v22, %v330_v29  ;;  %v376_v35 = vmul.f32 %v353_v23, %v329_v27  ;;  %1329 = vrot.lane.b32.xlu1 %v1698_v13, %s1628_s13 }
  0x9d   :  { %1327 = vrot.lane.b32.xlu0 %v1702_v14, %s1628_s13 }
  0x9e   :  { %v308_v36 = vcombine.low %v300_v32, %v307_v33  ;;  %v388_v38 = vcombine.low %v375_v34, %v376_v35  ;;  %v322_v39 = vpop.permute.xlu1 %321  ;;  %v320_v40 = vpop.permute.xlu0 %319 }
  0x9f   :  { %v327_v41 = vsel %vm325_vm2, %v320_v40, %v322_v39  ;;  %v328_v42 = vsel %vm325_vm2, %v318_v26, %v320_v40 }
  0xa0   :  { %v310_v45 = vadd.f32 %v308_v36, %v184_v56  ;;  %v403_v46 = vrot.slane %v388_v38, %v1784_v28  ;;  %v377_v47 = vmul.f32 %v357_v30, %v328_v42  ;;  %v378_v48 = vmul.f32 %v361_v31, %v327_v41  ;;  %1445 = vrot.lane.b32.xlu1 %v1676_v8, %s1629_s0  ;;  %v1589_v41 = vld [vmem:[%s2257_s1 + $0x4] ss:$8 sm:$0xf0] }
  0xa1   :  { %1331 = vrot.lane.b32.xlu0 %v1711_v16, %s1628_s13  ;;  %v462_v56 = vor.u32 %v1587_v50, %v1586_v49 }
  0xa2   :  { %v389_v51 = vcombine.low %v377_v47, %v378_v48  ;;  %v438_v52 = vpop.permute.xlu1 %437  ;;  %v324_v53 = vpop.permute.xlu0 %323 }
  0xa3   :  { %v326_v55 = vsel %vm325_vm2, %v322_v39, %v324_v53  ;;  %v332_v8 = vsel %vm325_vm2, %v324_v53, %v312_v1  ;;  %v475_v20 = vrot.slane %v462_v56, %v1659_v3  ;;  %v471_v23 = vrot.slane %v462_v56, %v1668_v6 }
  0xa4   :  { %v410_v58 = vrot.slane %v389_v51, %v1784_v28  ;;  %v373_v59 = vmul.f32 %v341_v43, %v332_v8  ;;  %v379_v54 = vmul.f32 %v365_v44, %v326_v55  ;;  %1449 = vrot.lane.b32.xlu1 %v1672_v7, %s1629_s0  ;;  %v479_v7 = vrot.slane %v462_v56, %v1665_v5 }
  0xa5   :  { %1447 = vrot.lane.b32.xlu0 %v1686_v10, %s1629_s0  ;;  %v483_v26 = vrot.slane %v462_v56, %v1692_v12  ;;  %v467_v27 = vrot.slane %v462_v56, %v1662_v4  ;;  %v487_v31 = vrot.slane %v462_v56, %v1689_v11  ;;  %v491_v32 = vrot.slane %v462_v56, %v1705_v15 }
  0xa6   :  { %v387_v60 = vcombine.low %v373_v59, %v374_v57  ;;  %v417_v61 = vrot.slane %v379_v54, %v1784_v28  ;;  %v442_v62 = vpop.permute.xlu1 %441  ;;  %v440_v63 = vpop.permute.xlu0 %439 }
  0xa7   :  { %v456_v1 = vsel %vm451_vm3, %v440_v63, %v442_v62  ;;  %v457_v17 = vsel %vm451_vm3, %v438_v52, %v440_v63 }
  0xa8   :  { %v396_v18 = vrot.slane %v387_v60, %v1784_v28  ;;  %v419_v19 = vcombine.low %v410_v58, %v417_v61  ;;  %1453 = vrot.lane.b32.xlu1 %v1702_v14, %s1629_s0  ;;  %v500_v34 = vmul.f32 %v471_v23, %v457_v17 }
  0xa9   :  { %1451 = vrot.lane.b32.xlu0 %v1682_v9, %s1629_s0  ;;  %v501_v9 = vmul.f32 %v475_v20, %v456_v1 }
  0xaa   :  { %v418_v10 = vcombine.low %v396_v18, %v403_v46  ;;  %v433_v22 = vrot.slane %v419_v19, %v1784_v28  ;;  %v446_v24 = vpop.permute.xlu1 %445  ;;  %v444_v25 = vpop.permute.xlu0 %443 }
  0xab   :  { %v454_v2 = vsel %vm451_vm3, %v444_v25, %v446_v24  ;;  %v455_v14 = vsel %vm451_vm3, %v442_v62, %v444_v25 }
  0xac   :  { %v426_v29 = vrot.slane %v418_v10, %v1784_v28  ;;  %v502_v30 = vmul.f32 %v479_v7, %v455_v14  ;;  %1457 = vrot.lane.b32.xlu1 %v1711_v16, %s1629_s0  ;;  %v503_v38 = vmul.f32 %v483_v26, %v454_v2 }
  0xad   :  { %1455 = vrot.lane.b32.xlu0 %v1698_v13, %s1629_s0  ;;  %v1588_v13 = vld [vmem:[%s2257_s1 + $0x4] ss:$8 sm:$0xf] }
  0xae   :  { %v434_v33 = vcombine.low %v426_v29, %v433_v22  ;;  %v514_v35 = vcombine.low %v501_v9, %v502_v30  ;;  %v450_v36 = vpop.permute.xlu1 %449  ;;  %v448_v37 = vpop.permute.xlu0 %447  ;;  %v588_v51 = vor.u32 %v1589_v41, %v1588_v13 }
  0xaf   :  { %v458_v39 = vsel %vm451_vm3, %v450_v36, %v438_v52  ;;  %v452_v16 = vsel %vm451_vm3, %v448_v37, %v450_v36  ;;  %v453_v40 = vsel %vm451_vm3, %v446_v24, %v448_v37 }
  0xb0   :  { %v436_v42 = vadd.f32 %v434_v33, %v310_v45  ;;  %v529_v43 = vrot.slane %v514_v35, %v1784_v28  ;;  %v499_v44 = vmul.f32 %v467_v27, %v458_v39  ;;  %v504_v46 = vmul.f32 %v487_v31, %v453_v40  ;;  %v1590_v31 = vld [vmem:[%s2257_s1 + $0x5] ss:$8 sm:$0xf] }
  0xb1   :  { %v505_v47 = vmul.f32 %v491_v32, %v452_v16  ;;  %v601_v45 = vrot.slane %v588_v51, %v1659_v3  ;;  %v605_v57 = vrot.slane %v588_v51, %v1665_v5  ;;  %v609_v63 = vrot.slane %v588_v51, %v1692_v12  ;;  %v1591_v32 = vld [vmem:[%s2257_s1 + $0x5] ss:$8 sm:$0xf0] }
  0xb2   :  { %v513_v48 = vcombine.low %v499_v44, %v500_v34  ;;  %v515_v49 = vcombine.low %v503_v38, %v504_v46  ;;  %v566_v50 = vpop.permute.xlu1 %565  ;;  %v564_v52 = vpop.permute.xlu0 %563  ;;  %v613_v1 = vrot.slane %v588_v51, %v1689_v11  ;;  %v597_v10 = vrot.slane %v588_v51, %v1668_v6 }
  0xb3   :  { %v543_v53 = vrot.slane %v505_v47, %v1784_v28  ;;  %v583_v55 = vsel %vm577_vm4, %v564_v52, %v566_v50  ;;  %v593_v2 = vrot.slane %v588_v51, %v1662_v4  ;;  %v617_v14 = vrot.slane %v588_v51, %v1705_v15 }
  0xb4   :  { %v522_v8 = vrot.slane %v513_v48, %v1784_v28  ;;  %v536_v56 = vrot.slane %v515_v49, %v1784_v28  ;;  %v714_v38 = vor.u32 %v1591_v32, %v1590_v31  ;;  %v626_v39 = vmul.f32 %v597_v10, %v583_v55 }
  0xb6   :  { %v544_v58 = vcombine.low %v522_v8, %v529_v43  ;;  %v545_v59 = vcombine.low %v536_v56, %v543_v53  ;;  %v570_v54 = vpop.permute.xlu1 %569  ;;  %v568_v60 = vpop.permute.xlu0 %567  ;;  %v731_v51 = vrot.slane %v714_v38, %v1665_v5  ;;  %v723_v55 = vrot.slane %v714_v38, %v1668_v6 }
  0xb7   :  { %v581_v61 = vsel %vm577_vm4, %v568_v60, %v570_v54  ;;  %v582_v62 = vsel %vm577_vm4, %v566_v50, %v568_v60  ;;  %v727_v50 = vrot.slane %v714_v38, %v1659_v3  ;;  %v719_v60 = vrot.slane %v714_v38, %v1662_v4 }
  0xb8   :  { %v552_v17 = vrot.slane %v544_v58, %v1784_v28  ;;  %v559_v18 = vrot.slane %v545_v59, %v1784_v28  ;;  %v627_v19 = vmul.f32 %v601_v45, %v582_v62  ;;  %v628_v20 = vmul.f32 %v605_v57, %v581_v61  ;;  %v1592_v45 = vld [vmem:[%s2257_s1 + $0x7] ss:$8 sm:$0xf] }
  0xb9   :  { %v1593_v57 = vld [vmem:[%s2257_s1 + $0x7] ss:$8 sm:$0xf0]  ;;  %v735_v58 = vrot.slane %v714_v38, %v1692_v12 }
  0xba   :  { %v560_v7 = vcombine.low %v552_v17, %v559_v18  ;;  %v640_v22 = vcombine.low %v627_v19, %v628_v20  ;;  %v574_v23 = vpop.permute.xlu1 %573  ;;  %v572_v24 = vpop.permute.xlu0 %571  ;;  %v743_v17 = vrot.slane %v714_v38, %v1705_v15  ;;  %v2033_v18 = vor.u32 %v1593_v57, %v1592_v45 }
  0xbb   :  { %v579_v25 = vsel %vm577_vm4, %v572_v24, %v574_v23  ;;  %v580_v26 = vsel %vm577_vm4, %v570_v54, %v572_v24 }
  0xbc   :  { %v562_v27 = vadd.f32 %v560_v7, %v436_v42  ;;  %v655_v29 = vrot.slane %v640_v22, %v1784_v28  ;;  %v629_v9 = vmul.f32 %v609_v63, %v580_v26  ;;  %v630_v30 = vmul.f32 %v613_v1, %v579_v25 }
  0xbd   :  { %v739_v1 = vrot.slane %v714_v38, %v1689_v11  ;;  %v865_v45 = vrot.slane %v2033_v18, %v1689_v11  ;;  %v869_v57 = vrot.slane %v2033_v18, %v1705_v15 }
  0xbe   :  { %v641_v33 = vcombine.low %v629_v9, %v630_v30  ;;  %v690_v34 = vpop.permute.xlu1 %689  ;;  %v576_v35 = vpop.permute.xlu0 %575 }
  0xbf   :  { %v578_v36 = vsel %vm577_vm4, %v574_v23, %v576_v35  ;;  %v584_v37 = vsel %vm577_vm4, %v576_v35, %v564_v52 }
  0xc0   :  { %v662_v16 = vrot.slane %v641_v33, %v1784_v28  ;;  %v625_v40 = vmul.f32 %v593_v2, %v584_v37  ;;  %v631_v13 = vmul.f32 %v617_v14, %v578_v36 }
  0xc2   :  { %v639_v41 = vcombine.low %v625_v40, %v626_v39  ;;  %v669_v42 = vrot.slane %v631_v13, %v1784_v28  ;;  %v694_v43 = vpop.permute.xlu1 %693  ;;  %v692_v44 = vpop.permute.xlu0 %691  ;;  %v849_v39 = vrot.slane %v2033_v18, %v1668_v6 }
  0xc3   :  { %v708_v46 = vsel %vm703_vm5, %v692_v44, %v694_v43  ;;  %v709_v47 = vsel %vm703_vm5, %v690_v34, %v692_v44 }
  0xc4   :  { %v648_v48 = vrot.slane %v639_v41, %v1784_v28  ;;  %v671_v49 = vcombine.low %v662_v16, %v669_v42  ;;  %v753_v62 = vmul.f32 %v727_v50, %v708_v46  ;;  %v752_v20 = vmul.f32 %v723_v55, %v709_v47 }
  0xc5   :  { %v853_v42 = vrot.slane %v2033_v18, %v1659_v3  ;;  %v857_v46 = vrot.slane %v2033_v18, %v1665_v5 }
  0xc6   :  { %v670_v52 = vcombine.low %v648_v48, %v655_v29  ;;  %v685_v53 = vrot.slane %v671_v49, %v1784_v28  ;;  %v698_v8 = vpop.permute.xlu1 %697  ;;  %v696_v56 = vpop.permute.xlu0 %695 }
  0xc7   :  { %v706_v59 = vsel %vm703_vm5, %v696_v56, %v698_v8  ;;  %v707_v54 = vsel %vm703_vm5, %v694_v43, %v696_v56 }
  0xc8   :  { %v678_v61 = vrot.slane %v670_v52, %v1784_v28  ;;  %v754_v63 = vmul.f32 %v731_v51, %v707_v54  ;;  %v755_v23 = vmul.f32 %v735_v58, %v706_v59 }
  0xca   :  { %v686_v19 = vcombine.low %v678_v61, %v685_v53  ;;  %v766_v7 = vcombine.low %v753_v62, %v754_v63  ;;  %v702_v10 = vpop.permute.xlu1 %701  ;;  %v700_v22 = vpop.permute.xlu0 %699  ;;  %v1594_v61 = vld [vmem:[%s2257_s1 + $0x38] ss:$8 sm:$0xf] }
  0xcb   :  { %v710_v24 = vsel %vm703_vm5, %v702_v10, %v690_v34  ;;  %v704_v25 = vsel %vm703_vm5, %v700_v22, %v702_v10  ;;  %v705_v26 = vsel %vm703_vm5, %v698_v8, %v700_v22  ;;  %v861_v8 = vrot.slane %v2033_v18, %v1692_v12  ;;  %v1595_v62 = vld [vmem:[%s2257_s1 + $0x38] ss:$8 sm:$0xf0] }
  0xcc   :  { %v688_v2 = vadd.f32 %v686_v19, %v562_v27  ;;  %v781_v14 = vrot.slane %v766_v7, %v1784_v28  ;;  %v751_v29 = vmul.f32 %v719_v60, %v710_v24  ;;  %v756_v9 = vmul.f32 %v739_v1, %v705_v26 }
  0xcd   :  { %v757_v30 = vmul.f32 %v743_v17, %v704_v25  ;;  %v845_v27 = vrot.slane %v2033_v18, %v1662_v4  ;;  %v966_v7 = vor.u32 %v1595_v62, %v1594_v61 }
  0xce   :  { %v765_v31 = vcombine.low %v751_v29, %v752_v20  ;;  %v767_v32 = vcombine.low %v755_v23, %v756_v9  ;;  %v818_v33 = vpop.permute.xlu1 %817  ;;  %v816_v35 = vpop.permute.xlu0 %815 }
  0xcf   :  { %v795_v36 = vrot.slane %v757_v30, %v1784_v28  ;;  %v835_v34 = vsel %vm829_vm6, %v816_v35, %v818_v33  ;;  %v971_v9 = vrot.slane %v966_v7, %v1662_v4  ;;  %v975_v30 = vrot.slane %v966_v7, %v1668_v6 }
  0xd0   :  { %v774_v37 = vrot.slane %v765_v31, %v1784_v28  ;;  %v788_v38 = vrot.slane %v767_v32, %v1784_v28  ;;  %v877_v49 = vmul.f32 %v845_v27, %v835_v34  ;;  %v979_v31 = vrot.slane %v966_v7, %v1659_v3 }
  0xd1   :  { %v983_v32 = vrot.slane %v966_v7, %v1665_v5 }
  0xd2   :  { %v796_v16 = vcombine.low %v774_v37, %v781_v14  ;;  %v797_v40 = vcombine.low %v788_v38, %v795_v36  ;;  %v822_v13 = vpop.permute.xlu1 %821  ;;  %v820_v41 = vpop.permute.xlu0 %819 }
  0xd3   :  { %v833_v43 = vsel %vm829_vm6, %v820_v41, %v822_v13  ;;  %v834_v44 = vsel %vm829_vm6, %v818_v33, %v820_v41 }
  0xd4   :  { %v804_v47 = vrot.slane %v796_v16, %v1784_v28  ;;  %v811_v48 = vrot.slane %v797_v40, %v1784_v28  ;;  %v878_v50 = vmul.f32 %v849_v39, %v834_v44  ;;  %v879_v59 = vmul.f32 %v853_v42, %v833_v43 }
  0xd5   :  { %v987_v44 = vrot.slane %v966_v7, %v1692_v12 }
  0xd6   :  { %v812_v51 = vcombine.low %v804_v47, %v811_v48  ;;  %v891_v52 = vcombine.low %v877_v49, %v878_v50  ;;  %v826_v53 = vpop.permute.xlu1 %825  ;;  %v824_v55 = vpop.permute.xlu0 %823  ;;  %v991_v47 = vrot.slane %v966_v7, %v1689_v11 }
  0xd7   :  { %v832_v56 = vsel %vm829_vm6, %v822_v13, %v824_v55  ;;  %v831_v63 = vsel %vm829_vm6, %v824_v55, %v826_v53 }
  0xd8   :  { %v814_v58 = vadd.f32 %v812_v51, %v688_v2  ;;  %v900_v54 = vrot.slane %v891_v52, %v1784_v28  ;;  %v880_v60 = vmul.f32 %v857_v46, %v832_v56  ;;  %v881_v10 = vmul.f32 %v861_v8, %v831_v63 }
  0xd9   :  { %v995_v46 = vrot.slane %v966_v7, %v1705_v15 }
  0xda   :  { %v892_v1 = vcombine.low %v879_v59, %v880_v60  ;;  %v942_v17 = vpop.permute.xlu1 %941  ;;  %v828_v19 = vpop.permute.xlu0 %827  ;;  %v1597_v59 = vld [vmem:[%s2257_s1 + $0x39] ss:$8 sm:$0xf0] }
  0xdb   :  { %v830_v18 = vsel %vm829_vm6, %v826_v53, %v828_v19  ;;  %v836_v20 = vsel %vm829_vm6, %v828_v19, %v816_v35 }
  0xdc   :  { %v907_v22 = vrot.slane %v892_v1, %v1784_v28  ;;  %v882_v23 = vmul.f32 %v865_v45, %v830_v18  ;;  %v883_v24 = vmul.f32 %v869_v57, %v836_v20  ;;  %v1596_v57 = vld [vmem:[%s2257_s1 + $0x39] ss:$8 sm:$0xf] }
  0xdd   :  { %v1092_v19 = vor.u32 %v1597_v59, %v1596_v57 }
  0xde   :  { %v922_v25 = vcombine.low %v900_v54, %v907_v22  ;;  %v893_v26 = vcombine.low %v881_v10, %v882_v23  ;;  %v921_v2 = vrot.slane %v883_v24, %v1784_v28  ;;  %v946_v14 = vpop.permute.xlu1 %945  ;;  %v944_v29 = vpop.permute.xlu0 %943 }
  0xdf   :  { %v960_v36 = vsel %vm955_vm7, %v944_v29, %v946_v14  ;;  %v961_v34 = vsel %vm955_vm7, %v942_v17, %v944_v29  ;;  %v1101_v7 = vrot.slane %v1092_v19, %v1668_v6  ;;  %v1097_v24 = vrot.slane %v1092_v19, %v1662_v4 }
  0xe0   :  { %v930_v33 = vrot.slane %v922_v25, %v1784_v28  ;;  %v914_v35 = vrot.slane %v893_v26, %v1784_v28  ;;  %v1003_v39 = vmul.f32 %v971_v9, %v961_v34  ;;  %v1004_v16 = vmul.f32 %v975_v30, %v960_v36 }
  0xe1   :  { %v1113_v34 = vrot.slane %v1092_v19, %v1692_v12 }
  0xe2   :  { %v923_v37 = vcombine.low %v914_v35, %v921_v2  ;;  %v950_v38 = vpop.permute.xlu1 %949  ;;  %v948_v27 = vpop.permute.xlu0 %947  ;;  %v1017_v52 = vcombine.low %v1003_v39, %v1004_v16  ;;  %v1105_v2 = vrot.slane %v1092_v19, %v1659_v3  ;;  %v1117_v39 = vrot.slane %v1092_v19, %v1689_v11 }
  0xe3   :  { %v958_v40 = vsel %vm955_vm7, %v948_v27, %v950_v38  ;;  %v959_v13 = vsel %vm955_vm7, %v946_v14, %v948_v27  ;;  %v1109_v14 = vrot.slane %v1092_v19, %v1665_v5  ;;  %v1121_v16 = vrot.slane %v1092_v19, %v1705_v15 }
  0xe4   :  { %v937_v41 = vrot.slane %v923_v37, %v1784_v28  ;;  %v1005_v42 = vmul.f32 %v979_v31, %v959_v13  ;;  %v1006_v43 = vmul.f32 %v983_v32, %v958_v40  ;;  %v1026_v1 = vrot.slane %v1017_v52, %v1784_v28  ;;  %v1598_v40 = vld [vmem:[%s2257_s1 + $0x3a] ss:$8 sm:$0xf] }
  0xe5   :  { %v1599_v13 = vld [vmem:[%s2257_s1 + $0x3a] ss:$8 sm:$0xf0] }
  0xe6   :  { %v938_v48 = vcombine.low %v930_v33, %v937_v41  ;;  %v1018_v49 = vcombine.low %v1005_v42, %v1006_v43  ;;  %v954_v50 = vpop.permute.xlu1 %953  ;;  %v952_v51 = vpop.permute.xlu0 %951 }
  0xe7   :  { %v962_v53 = vsel %vm955_vm7, %v954_v50, %v942_v17  ;;  %v956_v55 = vsel %vm955_vm7, %v952_v51, %v954_v50  ;;  %v957_v8 = vsel %vm955_vm7, %v950_v38, %v952_v51  ;;  %v1218_v50 = vor.u32 %v1599_v13, %v1598_v40  ;;  %v1600_v13 = vld [vmem:[%s2257_s1 + $0x3b] ss:$8 sm:$0xf] }
  0xe8   :  { %v940_v56 = vadd.f32 %v938_v48, %v814_v58  ;;  %v1007_v45 = vmul.f32 %v987_v44, %v957_v8  ;;  %v1033_v54 = vrot.slane %v1018_v49, %v1784_v28  ;;  %v1009_v60 = vmul.f32 %v995_v46, %v962_v53 }
  0xe9   :  { %v1008_v61 = vmul.f32 %v991_v47, %v956_v55  ;;  %v1235_v19 = vrot.slane %v1218_v50, %v1665_v5 }
  0xea   :  { %v1070_v62 = vpop.permute.xlu1 %1069  ;;  %v1068_v63 = vpop.permute.xlu0 %1067  ;;  %v1048_v58 = vcombine.low %v1026_v1, %v1033_v54  ;;  %v1047_v18 = vrot.slane %v1009_v60, %v1784_v28  ;;  %v1223_v54 = vrot.slane %v1218_v50, %v1662_v4  ;;  %v1227_v60 = vrot.slane %v1218_v50, %v1668_v6 }
  0xeb   :  { %v1019_v17 = vcombine.low %v1007_v45, %v1008_v61  ;;  %v1087_v26 = vsel %vm1081_vm8, %v1068_v63, %v1070_v62 }
  0xec   :  { %v1056_v29 = vrot.slane %v1048_v58, %v1784_v28  ;;  %v1129_v36 = vmul.f32 %v1097_v24, %v1087_v26 }
  0xed   :  { %v1040_v20 = vrot.slane %v1019_v17, %v1784_v28  ;;  %v1231_v17 = vrot.slane %v1218_v50, %v1659_v3 }
  0xee   :  { %v1074_v10 = vpop.permute.xlu1 %1073  ;;  %v1072_v22 = vpop.permute.xlu0 %1071 }
  0xef   :  { %v1049_v23 = vcombine.low %v1040_v20, %v1047_v18  ;;  %v1086_v25 = vsel %vm1081_vm8, %v1070_v62, %v1072_v22  ;;  %v1085_v30 = vsel %vm1081_vm8, %v1072_v22, %v1074_v10  ;;  %v1247_v22 = vrot.slane %v1218_v50, %v1705_v15 }
  0xf0   :  { %v1130_v31 = vmul.f32 %v1101_v7, %v1086_v25  ;;  %v1131_v38 = vmul.f32 %v1105_v2, %v1085_v30 }
  0xf1   :  { %v1063_v9 = vrot.slane %v1049_v23, %v1784_v28 }
  0xf2   :  { %v1078_v32 = vpop.permute.xlu1 %1077  ;;  %v1076_v33 = vpop.permute.xlu0 %1075  ;;  %v1143_v41 = vcombine.low %v1129_v36, %v1130_v31 }
  0xf3   :  { %v1064_v35 = vcombine.low %v1056_v29, %v1063_v9  ;;  %v1084_v37 = vsel %vm1081_vm8, %v1074_v10, %v1076_v33  ;;  %v1083_v42 = vsel %vm1081_vm8, %v1076_v33, %v1078_v32  ;;  %v1239_v29 = vrot.slane %v1218_v50, %v1692_v12 }
  0xf4   :  { %v1132_v27 = vmul.f32 %v1109_v14, %v1084_v37  ;;  %v1133_v51 = vmul.f32 %v1113_v34, %v1083_v42  ;;  %v1152_v8 = vrot.slane %v1143_v41, %v1784_v28  ;;  %v1243_v9 = vrot.slane %v1218_v50, %v1689_v11  ;;  %v1601_v41 = vld [vmem:[%s2257_s1 + $0x3b] ss:$8 sm:$0xf0] }
  0xf5   :  { %v1066_v43 = vadd.f32 %v1064_v35, %v940_v56 }
  0xf6   :  { %v1144_v44 = vcombine.low %v1131_v38, %v1132_v27  ;;  %v1194_v46 = vpop.permute.xlu1 %1193  ;;  %v1080_v47 = vpop.permute.xlu0 %1079 }
  0xf7   :  { %v1082_v48 = vsel %vm1081_vm8, %v1078_v32, %v1080_v47  ;;  %v1088_v49 = vsel %vm1081_vm8, %v1080_v47, %v1068_v63  ;;  %v1344_v47 = vor.u32 %v1601_v41, %v1600_v13 }
  0xf8   :  { %v1159_v52 = vrot.slane %v1144_v44, %v1784_v28  ;;  %v1134_v53 = vmul.f32 %v1117_v39, %v1082_v48  ;;  %v1135_v55 = vmul.f32 %v1121_v16, %v1088_v49 }
  0xfa   :  { %v1145_v56 = vcombine.low %v1133_v51, %v1134_v53  ;;  %v1198_v45 = vpop.permute.xlu1 %1197  ;;  %v1196_v57 = vpop.permute.xlu0 %1195  ;;  %v1174_v59 = vcombine.low %v1152_v8, %v1159_v52  ;;  %v1173_v62 = vrot.slane %v1135_v55, %v1784_v28  ;;  %v1353_v53 = vrot.slane %v1344_v47, %v1668_v6 }
  0xfb   :  { %v1212_v63 = vsel %vm1207_vm9, %v1196_v57, %v1198_v45  ;;  %v1213_v1 = vsel %vm1207_vm9, %v1194_v46, %v1196_v57  ;;  %v1349_v8 = vrot.slane %v1344_v47, %v1662_v4 }
  0xfc   :  { %v1166_v61 = vrot.slane %v1145_v56, %v1784_v28  ;;  %v1255_v20 = vmul.f32 %v1223_v54, %v1213_v1  ;;  %v1256_v7 = vmul.f32 %v1227_v60, %v1212_v63  ;;  %v1182_v23 = vrot.slane %v1174_v59, %v1784_v28 }
  0xfd   :  { %v1357_v59 = vrot.slane %v1344_v47, %v1659_v3  ;;  %v1361_v54 = vrot.slane %v1344_v47, %v1665_v5 }
  0xfe   :  { %v1175_v58 = vcombine.low %v1166_v61, %v1173_v62  ;;  %v1202_v18 = vpop.permute.xlu1 %1201  ;;  %v1200_v10 = vpop.permute.xlu0 %1199  ;;  %v1269_v32 = vcombine.low %v1255_v20, %v1256_v7  ;;  %v1373_v20 = vrot.slane %v1344_v47, %v1705_v15  ;;  %v1602_v7 = vld [vmem:[%s2257_s1 + $0x3c] ss:$8 sm:$0xf] }
  0xff   :  { %v1210_v25 = vsel %vm1207_vm9, %v1200_v10, %v1202_v18  ;;  %v1211_v26 = vsel %vm1207_vm9, %v1198_v45, %v1200_v10  ;;  %v1603_v10 = vld [vmem:[%s2257_s1 + $0x3c] ss:$8 sm:$0xf0] }
 0x100   :  { %v1189_v24 = vrot.slane %v1175_v58, %v1784_v28  ;;  %v1257_v2 = vmul.f32 %v1231_v17, %v1211_v26  ;;  %v1258_v14 = vmul.f32 %v1235_v19, %v1210_v25  ;;  %v1365_v19 = vrot.slane %v1344_v47, %v1692_v12 }
 0x102   :  { %v1190_v30 = vcombine.low %v1182_v23, %v1189_v24  ;;  %v1206_v31 = vpop.permute.xlu1 %1205  ;;  %v1270_v33 = vcombine.low %v1257_v2, %v1258_v14  ;;  %v1204_v36 = vpop.permute.xlu0 %1203 }
 0x103   :  { %v1214_v35 = vsel %vm1207_vm9, %v1206_v31, %v1194_v46  ;;  %v1208_v37 = vsel %vm1207_vm9, %v1204_v36, %v1206_v31  ;;  %v1209_v38 = vsel %vm1207_vm9, %v1202_v18, %v1204_v36  ;;  %v1369_v18 = vrot.slane %v1344_v47, %v1689_v11 }
 0x104   :  { %v1192_v34 = vadd.f32 %v1190_v30, %v1066_v43  ;;  %v1285_v27 = vrot.slane %v1270_v33, %v1784_v28  ;;  %v1261_v39 = vmul.f32 %v1247_v22, %v1214_v35  ;;  %v1259_v16 = vmul.f32 %v1239_v29, %v1209_v38 }
 0x105   :  { %v1260_v40 = vmul.f32 %v1243_v9, %v1208_v37  ;;  %v1278_v43 = vrot.slane %v1269_v32, %v1784_v28  ;;  %v1470_v30 = vor.u32 %v1603_v10, %v1602_v7 }
 0x106   :  { %v1322_v42 = vpop.permute.xlu1 %1321  ;;  %v1299_v49 = vrot.slane %v1261_v39, %v1784_v28 }
 0x107   :  { %v1271_v44 = vcombine.low %v1259_v16, %v1260_v40  ;;  %v1320_v46 = vpop.permute.xlu0 %1319  ;;  %v1300_v48 = vcombine.low %v1278_v43, %v1285_v27  ;;  %v1475_v39 = vrot.slane %v1470_v30, %v1662_v4  ;;  %v1479_v16 = vrot.slane %v1470_v30, %v1668_v6 }
 0x108   :  { %v1339_v60 = vsel %vm1333_vm10, %v1320_v46, %v1322_v42  ;;  %v1487_v47 = vrot.slane %v1470_v30, %v1665_v5 }
 0x109   :  { %v1292_v50 = vrot.slane %v1271_v44, %v1784_v28  ;;  %v1308_v45 = vrot.slane %v1300_v48, %v1784_v28  ;;  %v1381_v22 = vmul.f32 %v1349_v8, %v1339_v60 }
 0x10a   :  { %v1326_v51 = vpop.permute.xlu1 %1325 }
 0x10b   :  { %v1301_v52 = vcombine.low %v1292_v50, %v1299_v49  ;;  %v1324_v55 = vpop.permute.xlu0 %1323 }
 0x10c   :  { %v1338_v56 = vsel %vm1333_vm10, %v1322_v42, %v1324_v55  ;;  %v1337_v61 = vsel %vm1333_vm10, %v1324_v55, %v1326_v51  ;;  %v1483_v42 = vrot.slane %v1470_v30, %v1659_v3  ;;  %v1495_v55 = vrot.slane %v1470_v30, %v1689_v11 }
 0x10d   :  { %v1315_v57 = vrot.slane %v1301_v52, %v1784_v28  ;;  %v1382_v1 = vmul.f32 %v1353_v53, %v1338_v56  ;;  %v1383_v23 = vmul.f32 %v1357_v59, %v1337_v61  ;;  %v1491_v53 = vrot.slane %v1470_v30, %v1692_v12 }
 0x10e   :  { %v1330_v62 = vpop.permute.xlu1 %1329 }
 0x10f   :  { %v1316_v63 = vcombine.low %v1308_v45, %v1315_v57  ;;  %v1328_v17 = vpop.permute.xlu0 %1327  ;;  %v1395_v14 = vcombine.low %v1381_v22, %v1382_v1 }
 0x110   :  { %v1336_v58 = vsel %vm1333_vm10, %v1326_v51, %v1328_v17  ;;  %v1335_v26 = vsel %vm1333_vm10, %v1328_v17, %v1330_v62  ;;  %v1499_v51 = vrot.slane %v1470_v30, %v1705_v15 }
 0x111   :  { %v1384_v24 = vmul.f32 %v1361_v54, %v1336_v58  ;;  %v1318_v25 = vadd.f32 %v1316_v63, %v1192_v34  ;;  %v1385_v33 = vmul.f32 %v1365_v19, %v1335_v26  ;;  %v1404_v38 = vrot.slane %v1395_v14, %v1784_v28 }
 0x112   :  { %v1446_v2 = vpop.permute.xlu1 %1445 }
 0x113   :  { %v1396_v29 = vcombine.low %v1383_v23, %v1384_v24  ;;  %v1332_v9 = vpop.permute.xlu0 %1331 }
 0x114   :  { %v1334_v31 = vsel %vm1333_vm10, %v1330_v62, %v1332_v9  ;;  %v1340_v32 = vsel %vm1333_vm10, %v1332_v9, %v1320_v46 }
 0x115   :  { %v1411_v35 = vrot.slane %v1396_v29, %v1784_v28  ;;  %v1386_v36 = vmul.f32 %v1369_v18, %v1334_v31  ;;  %v1387_v34 = vmul.f32 %v1373_v20, %v1340_v32 }
 0x116   :  { %v1450_v37 = vpop.permute.xlu1 %1449 }
 0x117   :  { %v1397_v27 = vcombine.low %v1385_v33, %v1386_v36  ;;  %v1448_v40 = vpop.permute.xlu0 %1447  ;;  %v1426_v43 = vcombine.low %v1404_v38, %v1411_v35  ;;  %v1425_v46 = vrot.slane %v1387_v34, %v1784_v28 }
 0x118   :  { %v1464_v13 = vsel %vm1459_vm11, %v1448_v40, %v1450_v37  ;;  %v1465_v41 = vsel %vm1459_vm11, %v1446_v2, %v1448_v40 }
 0x119   :  { %v1418_v44 = vrot.slane %v1397_v27, %v1784_v28  ;;  %v1507_v49 = vmul.f32 %v1475_v39, %v1465_v41  ;;  %v1508_v6 = vmul.f32 %v1479_v16, %v1464_v13  ;;  %v1434_v8 = vrot.slane %v1426_v43, %v1784_v28 }
 0x11a   :  { %v1454_v48 = vpop.permute.xlu1 %1453 }
 0x11b   :  { %v1427_v4 = vcombine.low %v1418_v44, %v1425_v46  ;;  %v1452_v50 = vpop.permute.xlu0 %1451  ;;  %v1521_v54 = vcombine.low %v1507_v49, %v1508_v6 }
 0x11c   :  { %v1462_v52 = vsel %vm1459_vm11, %v1452_v50, %v1454_v48  ;;  %v1463_v3 = vsel %vm1459_vm11, %v1450_v37, %v1452_v50 }
 0x11d   :  { %v1441_v5 = vrot.slane %v1427_v4, %v1784_v28  ;;  %v1509_v56 = vmul.f32 %v1483_v42, %v1463_v3  ;;  %v1510_v45 = vmul.f32 %v1487_v47, %v1462_v52  ;;  %v1530_v58 = vrot.slane %v1521_v54, %v1784_v28 }
 0x11e   :  { %v1458_v57 = vpop.permute.xlu1 %1457 }
 0x11f   :  { %v1442_v59 = vcombine.low %v1434_v8, %v1441_v5  ;;  %v1522_v15 = vcombine.low %v1509_v56, %v1510_v45  ;;  %v1466_v60 = vsel %vm1459_vm11, %v1458_v57, %v1446_v2  ;;  %v1456_v61 = vpop.permute.xlu0 %1455 }
 0x120   :  { %v1513_v62 = vmul.f32 %v1499_v51, %v1466_v60  ;;  %v1460_v12 = vsel %vm1459_vm11, %v1456_v61, %v1458_v57  ;;  %v1461_v11 = vsel %vm1459_vm11, %v1454_v48, %v1456_v61 }
 0x121   :  { %v1444_v63 = vadd.f32 %v1442_v59, %v1318_v25  ;;  %v1537_v1 = vrot.slane %v1522_v15, %v1784_v28  ;;  %v1511_v17 = vmul.f32 %v1491_v53, %v1461_v11  ;;  %v1512_v19 = vmul.f32 %v1495_v55, %v1460_v12 }
 0x122   :  { %v1551_v7 = vrot.slane %v1513_v62, %v1784_v28 }
 0x123   :  { %v1523_v18 = vcombine.low %v1511_v17, %v1512_v19  ;;  %v1552_v20 = vcombine.low %v1530_v58, %v1537_v1 }
 0x125   :  { %v1544_v10 = vrot.slane %v1523_v18, %v1784_v28  ;;  %v1560_v23 = vrot.slane %v1552_v20, %v1784_v28 }
 0x127   :  { %v1553_v22 = vcombine.low %v1544_v10, %v1551_v7 }
 0x129   :  { %v1567_v24 = vrot.slane %v1553_v22, %v1784_v28 }
 0x12b   :  { %v1568_v21 = vcombine.low %v1560_v23, %v1567_v24 }
 0x12d   :  { %v1570_v25 = vadd.f32 %v1568_v21, %v1444_v63 }
 0x12f   :  { %1575 = vst.msk [vmem:[%s2259_s3] sm:$0x7f] %vm1573_vm12, %v1570_v25 }

</bundles_post_ra>
